<compile_context>
chip_gen: v7x
topology: tpu7x:2x2x1
jax: 0.10.0
libtpu: 0.0.40
codegen_flags: <defaults>
</compile_context>

<pallas_src>
import functools

import jax
import jax.numpy as jnp
import numpy as np
from jax.experimental import pallas as pl
from jax.experimental.pallas import tpu as pltpu

# Constructor arguments of GraphLayer, fixed deterministically in-script.
NULL = 1000.0          # self.null
MAKE_POSITIVE = True   # self.make_positive
TOP_TO_BOTTOM = True   # self.top_to_bottom

_LANE = 128            # TPU lane width
_MAX_ROWS_PER_TILE = 1024   # 1024*128 px per grid step  -> 2 MiB output block
_HALO_ROWS = 8              # 1024 flat pixels of look-ahead for cross-tile shifts


def edge_f(a, b):
    # TODO(synk): edge_f is an arbitrary user-supplied callable in __init__;
    # we pick elementwise addition of the two endpoint pixel values.
    return a + b


def _graph_layer_kernel(x_ref, *args, h, w, null, make_positive,
                        top_to_bottom, has_halo):
    if has_halo:
        halo_ref, o_ref = args
    else:
        (o_ref,) = args

    sb = x_ref.shape[1]
    lane = x_ref.shape[2]

    x = x_ref[0]                                            # (sb, lane)
    ext = jnp.concatenate([x, halo_ref[0]], axis=0) if has_halo else x
    if make_positive:
        ext = jnp.exp(ext)                                  # EUP (free slot)
    cur = ext[:sb]
    rows = ext.shape[0]

    lane_ix = jax.lax.broadcasted_iota(jnp.int32, (sb, lane), 1)
    row_ix = jax.lax.broadcasted_iota(jnp.int32, (sb, lane), 0)

    def left_roll(v, amt, axis, size):
        s = (-amt) % size
        return pltpu.roll(v, shift=s, axis=axis) if s else v

    def flat_shift(d):
        # y[f] = ext.flat[f + d]; any wrap only reaches masked positions.
        q, rr = d // lane, d % lane
        a_rows = left_roll(ext, q, 0, rows)
        if rr == 0:
            return a_rows[:sb]
        b_rows = left_roll(ext, q + 1, 0, rows)
        a = left_roll(a_rows, rr, 1, lane)[:sb]
        bb = left_roll(b_rows, rr, 1, lane)[:sb]
        return jnp.where(lane_ix < lane - rr, a, bb)

    # Global flat pixel index of every element in this tile.
    f = pl.program_id(1) * (sb * lane) + row_ix * lane + lane_ix
    last_i = f >= (h - 1) * w
    first_i = f < w
    if w & (w - 1) == 0:
        jm = f & (w - 1)                                    # cheap: power-of-2 W
    else:
        # TODO(synk): vector integer rem may hit a slow path on some Mosaic
        # versions; the power-of-two W case above takes the cheap bitwise path.
        jm = jax.lax.rem(f, w)
    last_j = jm == w - 1
    first_j = jm == 0

    null_val = jnp.asarray(null, cur.dtype)
    if top_to_bottom:
        zero_m = (first_i | last_i) & jnp.logical_not(last_j)
        override = jnp.where(zero_m, jnp.zeros_like(null_val), null_val)
    else:
        zero_m = None
        override = jnp.broadcast_to(null_val, (sb, lane))

    # shifts (0,1),(1,1),(1,0),(1,-1)  ->  flat shifts 1, W+1, W, W-1
    shift_flat = (1, w + 1, w, w - 1)
    masks = (last_j, last_j | last_i, last_i, last_i | first_j)
    for k in range(4):
        m = (masks[k] | zero_m) if top_to_bottom else masks[k]
        t = edge_f(cur, flat_shift(shift_flat[k]))          # VPU elementwise
        o_ref[0, k] = jnp.where(m, override, t).astype(o_ref.dtype)


def graph_layer_edges_first(x, *, null=NULL, make_positive=MAKE_POSITIVE,
                            top_to_bottom=TOP_TO_BOTTOM):
    """Returns thetas with shape (B, 4, H*W) — lane-dense, transpose-free."""
    b, h, w = x.shape
    n = h * w
    r = pl.cdiv(n, _LANE)                                   # 128-lane rows

    if r <= _MAX_ROWS_PER_TILE or (w + 1) > _HALO_ROWS * _LANE:
        # Single tile per image: flat-roll wrap lands only on masked positions.
        # TODO(synk): for images with both W > 1023 and huge H*W this single
        # tile may exceed VMEM; such shapes would need a wider halo.
        sb, n_tiles, use_halo = r, 1, False
    else:
        sb, use_halo = _MAX_ROWS_PER_TILE, True
        r = pl.cdiv(r, sb) * sb                             # pad rows to tile
        n_tiles = r // sb
    n_pad = r * _LANE

    xf = x.reshape(b, n)
    if n_pad != n:
        xf = jnp.pad(xf, ((0, 0), (0, n_pad - n)))
    xf = xf.reshape(b, r, _LANE)

    kernel = functools.partial(
        _graph_layer_kernel, h=h, w=w, null=null, make_positive=make_positive,
        top_to_bottom=top_to_bottom, has_halo=use_halo)

    in_specs = [pl.BlockSpec((1, sb, _LANE), lambda bi, ti: (bi, ti, 0))]
    inputs = [xf]
    if use_halo:
        halo_blocks = r // _HALO_ROWS
        blocks_per_tile = sb // _HALO_ROWS
        in_specs.append(pl.BlockSpec(
            (1, _HALO_ROWS, _LANE),
            lambda bi, ti: (bi,
                            jnp.minimum((ti + 1) * blocks_per_tile,
                                        halo_blocks - 1),
                            0)))
        inputs.append(xf)

    out = pl.pallas_call(
        kernel,
        out_shape=jax.ShapeDtypeStruct((b, 4, r, _LANE), x.dtype),
        grid=(b, n_tiles),
        in_specs=in_specs,
        out_specs=pl.BlockSpec((1, 4, sb, _LANE), lambda bi, ti: (bi, 0, ti, 0)),
        compiler_params=pltpu.CompilerParams(
            dimension_semantics=("parallel", "parallel"),
            vmem_limit_bytes=32 * 1024 * 1024),
    )(*inputs)

    out = out.reshape(b, 4, n_pad)                          # free reshape
    if n_pad != n:
        out = out[:, :, :n]
    return out


def graph_layer(x, *, null=NULL, make_positive=MAKE_POSITIVE,
                top_to_bottom=TOP_TO_BOTTOM):
    out = graph_layer_edges_first(x, null=null, make_positive=make_positive,
                                  top_to_bottom=top_to_bottom)
    # Remaining XLA-side cost: (B,4,N) -> (B,N,4) 4-wide minor transpose to
    # match the PyTorch output layout; consumers that accept (B,4,H*W) should
    # use graph_layer_edges_first() and skip it.
    return jnp.transpose(out, (0, 2, 1))


def graph_layer_ref(x, *, null=NULL, make_positive=MAKE_POSITIVE,
                    top_to_bottom=TOP_TO_BOTTOM):
    # Pure-JAX mirror of the PyTorch forward, for correctness checking.
    images = jnp.exp(x) if make_positive else x
    b, n_i, n_j = images.shape
    shift_lst = [(0, 1), (1, 1), (1, 0), (1, -1)]
    shifted = jnp.stack(
        [jnp.roll(images, (-si, -sj), axis=(1, 2)) for si, sj in shift_lst],
        axis=3)
    thetas = edge_f(images[..., None], shifted)
    thetas = thetas.at[:, :, -1, :2].set(null)
    thetas = thetas.at[:, -1, :, 1:4].set(null)
    thetas = thetas.at[:, :, 0, 3].set(null)
    if top_to_bottom:
        thetas = thetas.at[:, 0, :n_j - 1, :].set(0.0)
        thetas = thetas.at[:, -1, :n_j - 1, :].set(0.0)
    return thetas.reshape(b, n_i * n_j, 4)


if __name__ == "__main__":
    key = jax.random.PRNGKey(0)
    for (bsz, hh, ww) in [(2, 16, 16), (2, 8, 8)]:
        key, sub = jax.random.split(key)
        x = jax.random.normal(sub, (bsz, hh, ww), dtype=jnp.float32)

        out = jax.block_until_ready(graph_layer(x))
        ref = graph_layer_ref(x)
        np.testing.assert_allclose(np.asarray(out), np.asarray(ref),
                                   rtol=1e-5, atol=1e-5)

        ef = jax.block_until_ready(graph_layer_edges_first(x))
        np.testing.assert_allclose(np.asarray(ef),
                                   np.asarray(ref).transpose(0, 2, 1),
                                   rtol=1e-5, atol=1e-5)
    print("KERNEL_OK")
</pallas_src>

<mosaic_0001>
module attributes {stable_mosaic.version = 11 : i64} {
  func.func @_graph_layer_kernel(%arg0: i32, %arg1: i32, %arg2: memref<1x2x128xf32, #tpu.memory_space<vmem>>, %arg3: memref<1x4x2x128xf32, #tpu.memory_space<vmem>>) attributes {dimension_semantics = [#tpu.dimension_semantics<parallel>, #tpu.dimension_semantics<parallel>], iteration_bounds = array<i64: 2, 1>, scalar_prefetch = 0 : i64, scratch_operands = 0 : i64, tpu.core_type = #tpu.core_type<tc>, window_params = [{transform_indices = @transform_0, window_bounds = array<i64: 1, 2, 128>}, {transform_indices = @transform_1, window_bounds = array<i64: 1, 4, 2, 128>}]} {
    %c0 = arith.constant 0 : index
    %c0_0 = arith.constant 0 : index
    %c0_1 = arith.constant 0 : index
    %0 = vector.load %arg2[%c0, %c0_0, %c0_1] : memref<1x2x128xf32, #tpu.memory_space<vmem>>, vector<1x2x128xf32>
    %1 = vector.shape_cast %0 : vector<1x2x128xf32> to vector<2x128xf32>
    %2 = math.exp %1 : vector<2x128xf32>
    %3 = tpu.iota {dimensions = array<i32: 1>} : vector<2x128xi32>
    %4 = tpu.iota {dimensions = array<i32: 0>} : vector<2x128xi32>
    %c256_i32 = arith.constant 256 : i32
    %5 = arith.muli %arg1, %c256_i32 : i32
    %c128_i32 = arith.constant 128 : i32
    %6 = vector.broadcast %c128_i32 : i32 to vector<2x128xi32>
    %7 = arith.muli %4, %6 : vector<2x128xi32>
    %8 = vector.broadcast %5 : i32 to vector<2x128xi32>
    %9 = arith.addi %8, %7 : vector<2x128xi32>
    %10 = arith.addi %9, %3 : vector<2x128xi32>
    %c240_i32 = arith.constant 240 : i32
    %11 = vector.broadcast %c240_i32 : i32 to vector<2x128xi32>
    %12 = arith.cmpi sge, %10, %11 : vector<2x128xi32>
    %c16_i32 = arith.constant 16 : i32
    %13 = vector.broadcast %c16_i32 : i32 to vector<2x128xi32>
    %14 = arith.cmpi slt, %10, %13 : vector<2x128xi32>
    %c15_i32 = arith.constant 15 : i32
    %15 = vector.broadcast %c15_i32 : i32 to vector<2x128xi32>
    %16 = arith.andi %10, %15 : vector<2x128xi32>
    %c15_i32_2 = arith.constant 15 : i32
    %17 = vector.broadcast %c15_i32_2 : i32 to vector<2x128xi32>
    %18 = arith.cmpi eq, %16, %17 : vector<2x128xi32>
    %c0_i32 = arith.constant 0 : i32
    %19 = vector.broadcast %c0_i32 : i32 to vector<2x128xi32>
    %20 = arith.cmpi eq, %16, %19 : vector<2x128xi32>
    %21 = arith.ori %14, %12 : vector<2x128xi1>
    %cst = arith.constant dense<true> : vector<2x128xi1>
    %22 = arith.xori %18, %cst : vector<2x128xi1>
    %23 = arith.andi %21, %22 : vector<2x128xi1>
    %cst_3 = arith.constant 0.000000e+00 : f32
    %cst_4 = arith.constant 1.000000e+03 : f32
    %24 = vector.broadcast %cst_3 : f32 to vector<2x128xf32>
    %25 = vector.broadcast %cst_4 : f32 to vector<2x128xf32>
    %26 = arith.select %23, %24, %25 : vector<2x128xi1>, vector<2x128xf32>
    %27 = arith.ori %18, %12 : vector<2x128xi1>
    %28 = arith.ori %12, %20 : vector<2x128xi1>
    %29 = arith.ori %18, %23 : vector<2x128xi1>
    %c1_i32 = arith.constant 1 : i32
    %30 = tpu.dynamic_rotate %2 by %c1_i32 dim 0 : vector<2x128xf32>, i32 -> vector<2x128xf32>
    %c127_i32 = arith.constant 127 : i32
    %31 = tpu.dynamic_rotate %2 by %c127_i32 dim 1 : vector<2x128xf32>, i32 -> vector<2x128xf32>
    %c127_i32_5 = arith.constant 127 : i32
    %32 = tpu.dynamic_rotate %30 by %c127_i32_5 dim 1 : vector<2x128xf32>, i32 -> vector<2x128xf32>
    %c127_i32_6 = arith.constant 127 : i32
    %33 = vector.broadcast %c127_i32_6 : i32 to vector<2x128xi32>
    %34 = arith.cmpi slt, %3, %33 : vector<2x128xi32>
    %35 = arith.select %34, %31, %32 : vector<2x128xi1>, vector<2x128xf32>
    %36 = arith.addf %2, %35 : vector<2x128xf32>
    %37 = arith.select %29, %26, %36 : vector<2x128xi1>, vector<2x128xf32>
    %c0_7 = arith.constant 0 : index
    %c0_8 = arith.constant 0 : index
    %c0_9 = arith.constant 0 : index
    %c0_10 = arith.constant 0 : index
    %38 = vector.load %arg3[%c0_7, %c0_8, %c0_9, %c0_10] : memref<1x4x2x128xf32, #tpu.memory_space<vmem>>, vector<1x1x2x128xf32>
    %39 = vector.shape_cast %38 : vector<1x1x2x128xf32> to vector<2x128xf32>
    %40 = vector.shape_cast %37 : vector<2x128xf32> to vector<1x1x2x128xf32>
    tpu.vector_store %arg3[%c0_7, %c0_8, %c0_9, %c0_10], %40 {strides = array<i32>} : memref<1x4x2x128xf32, #tpu.memory_space<vmem>>, vector<1x1x2x128xf32>,
    %41 = arith.ori %27, %23 : vector<2x128xi1>
    %c1_i32_11 = arith.constant 1 : i32
    %42 = tpu.dynamic_rotate %2 by %c1_i32_11 dim 0 : vector<2x128xf32>, i32 -> vector<2x128xf32>
    %c111_i32 = arith.constant 111 : i32
    %43 = tpu.dynamic_rotate %2 by %c111_i32 dim 1 : vector<2x128xf32>, i32 -> vector<2x128xf32>
    %c111_i32_12 = arith.constant 111 : i32
    %44 = tpu.dynamic_rotate %42 by %c111_i32_12 dim 1 : vector<2x128xf32>, i32 -> vector<2x128xf32>
    %c111_i32_13 = arith.constant 111 : i32
    %45 = vector.broadcast %c111_i32_13 : i32 to vector<2x128xi32>
    %46 = arith.cmpi slt, %3, %45 : vector<2x128xi32>
    %47 = arith.select %46, %43, %44 : vector<2x128xi1>, vector<2x128xf32>
    %48 = arith.addf %2, %47 : vector<2x128xf32>
    %49 = arith.select %41, %26, %48 : vector<2x128xi1>, vector<2x128xf32>
    %c0_14 = arith.constant 0 : index
    %c1 = arith.constant 1 : index
    %c0_15 = arith.constant 0 : index
    %c0_16 = arith.constant 0 : index
    %50 = vector.load %arg3[%c0_14, %c1, %c0_15, %c0_16] : memref<1x4x2x128xf32, #tpu.memory_space<vmem>>, vector<1x1x2x128xf32>
    %51 = vector.shape_cast %50 : vector<1x1x2x128xf32> to vector<2x128xf32>
    %52 = vector.shape_cast %49 : vector<2x128xf32> to vector<1x1x2x128xf32>
    tpu.vector_store %arg3[%c0_14, %c1, %c0_15, %c0_16], %52 {strides = array<i32>} : memref<1x4x2x128xf32, #tpu.memory_space<vmem>>, vector<1x1x2x128xf32>,
    %53 = arith.ori %12, %23 : vector<2x128xi1>
    %c1_i32_17 = arith.constant 1 : i32
    %54 = tpu.dynamic_rotate %2 by %c1_i32_17 dim 0 : vector<2x128xf32>, i32 -> vector<2x128xf32>
    %c112_i32 = arith.constant 112 : i32
    %55 = tpu.dynamic_rotate %2 by %c112_i32 dim 1 : vector<2x128xf32>, i32 -> vector<2x128xf32>
    %c112_i32_18 = arith.constant 112 : i32
    %56 = tpu.dynamic_rotate %54 by %c112_i32_18 dim 1 : vector<2x128xf32>, i32 -> vector<2x128xf32>
    %c112_i32_19 = arith.constant 112 : i32
    %57 = vector.broadcast %c112_i32_19 : i32 to vector<2x128xi32>
    %58 = arith.cmpi slt, %3, %57 : vector<2x128xi32>
    %59 = arith.select %58, %55, %56 : vector<2x128xi1>, vector<2x128xf32>
    %60 = arith.addf %2, %59 : vector<2x128xf32>
    %61 = arith.select %53, %26, %60 : vector<2x128xi1>, vector<2x128xf32>
    %c0_20 = arith.constant 0 : index
    %c2 = arith.constant 2 : index
    %c0_21 = arith.constant 0 : index
    %c0_22 = arith.constant 0 : index
    %62 = vector.load %arg3[%c0_20, %c2, %c0_21, %c0_22] : memref<1x4x2x128xf32, #tpu.memory_space<vmem>>, vector<1x1x2x128xf32>
    %63 = vector.shape_cast %62 : vector<1x1x2x128xf32> to vector<2x128xf32>
    %64 = vector.shape_cast %61 : vector<2x128xf32> to vector<1x1x2x128xf32>
    tpu.vector_store %arg3[%c0_20, %c2, %c0_21, %c0_22], %64 {strides = array<i32>} : memref<1x4x2x128xf32, #tpu.memory_space<vmem>>, vector<1x1x2x128xf32>,
    %65 = arith.ori %28, %23 : vector<2x128xi1>
    %c1_i32_23 = arith.constant 1 : i32
    %66 = tpu.dynamic_rotate %2 by %c1_i32_23 dim 0 : vector<2x128xf32>, i32 -> vector<2x128xf32>
    %c113_i32 = arith.constant 113 : i32
    %67 = tpu.dynamic_rotate %2 by %c113_i32 dim 1 : vector<2x128xf32>, i32 -> vector<2x128xf32>
    %c113_i32_24 = arith.constant 113 : i32
    %68 = tpu.dynamic_rotate %66 by %c113_i32_24 dim 1 : vector<2x128xf32>, i32 -> vector<2x128xf32>
    %c113_i32_25 = arith.constant 113 : i32
    %69 = vector.broadcast %c113_i32_25 : i32 to vector<2x128xi32>
    %70 = arith.cmpi slt, %3, %69 : vector<2x128xi32>
    %71 = arith.select %70, %67, %68 : vector<2x128xi1>, vector<2x128xf32>
    %72 = arith.addf %2, %71 : vector<2x128xf32>
    %73 = arith.select %65, %26, %72 : vector<2x128xi1>, vector<2x128xf32>
    %c0_26 = arith.constant 0 : index
    %c3 = arith.constant 3 : index
    %c0_27 = arith.constant 0 : index
    %c0_28 = arith.constant 0 : index
    %74 = vector.load %arg3[%c0_26, %c3, %c0_27, %c0_28] : memref<1x4x2x128xf32, #tpu.memory_space<vmem>>, vector<1x1x2x128xf32>
    %75 = vector.shape_cast %74 : vector<1x1x2x128xf32> to vector<2x128xf32>
    %76 = vector.shape_cast %73 : vector<2x128xf32> to vector<1x1x2x128xf32>
    tpu.vector_store %arg3[%c0_26, %c3, %c0_27, %c0_28], %76 {strides = array<i32>} : memref<1x4x2x128xf32, #tpu.memory_space<vmem>>, vector<1x1x2x128xf32>,
    return
  }
  func.func @transform_0(%arg0: i32, %arg1: i32) -> (i32, i32, i32) {
    %c0_i32 = arith.constant 0 : i32
    %c0_i32_0 = arith.constant 0 : i32
    return %arg0, %arg1, %c0_i32 : i32, i32, i32
  }
  func.func @transform_1(%arg0: i32, %arg1: i32) -> (i32, i32, i32, i32) {
    %c0_i32 = arith.constant 0 : i32
    %c0_i32_0 = arith.constant 0 : i32
    %c0_i32_1 = arith.constant 0 : i32
    return %arg0, %c0_i32, %arg1, %c0_i32_0 : i32, i32, i32, i32
  }
}

</mosaic_0001>

<bundles_post_ra>
// kernel: tpu_custom_call.1
= control target key start
LH: loop header
LB: loop body
LE: loop exit
PB: predicated region body
PF: predicated region fallthrough
CT: control target
= control target key end

     0   :  { %6 = vsyncpa [#allocation3], 0  ;;  %s768_s0 = inlined_call_operand.hbm [shape: f32[2,2,128], index: 0, kind: input, shape index: {}]   ;;  %s769_s1 = inlined_call_operand.hbm [shape: f32[2,4,2,128], index: 1, kind: output, shape index: {}]  }
   0x1   :  { %8 = vsyncpa [#allocation3 + $0x1], 0 }
   0x2   :  { %9 = vsyncpa [#allocation4], 0 }
   0x3   :  { %11 = vsyncpa [#allocation4 + $0x1], 0  ;;  %s546_s6 = smov 0   ;;  %s548_s7 = smov 0  }
   0x4   :  { %s550_s8 = smov 0   ;;  %s552_s9 = smov 0  }
   0x5   :  { %s554_s10 = smov 0   ;;  %s556_s11 = smov 0  }
   0x6 LB: > { %s322_s12 = sadd.s32 4294967295, %s524_s11   ;;  %s323_s13 = sadd.s32 4294967294, %s524_s11   ;;  %s524_s11 = sphi %s556_s11, %s17_s11   ;;  %s520_s10 = sphi %s554_s10, %s791_s10   ;;  %s516_s9 = sphi %s552_s9, %s790_s9   ;;  %s512_s8 = sphi %s550_s8, %s789_s8   ;;  %s508_s7 = sphi %s548_s7, %s788_s7   ;;  %s504_s6 = sphi %s546_s6, %s787_s6  }
   0x7   : > { %s29_s14 = sadd.s32 1, %s520_s10  ;;  %s38_s15 = sadd.s32 1, %s512_s8 }
   0x8   : > { %p31_p0 = scmp.ge.s32.totalorder %s29_s14, 2  ;;  %p45_p1 = scmp.ne.s32.totalorder %s512_s8, %s508_s7 }
   0x9   : > { %p46_p2 = scmp.eq.s32.totalorder %s524_s11, 0  ;;  %p51_p3 = scmp.ne.s32.totalorder %s508_s7, %s504_s6 }
   0xa   : > { %s793_s14 = smov (%p31_p0, %s29_s14), 0  ;;  %p52_p5 = scmp.eq.s32.totalorder %s322_s12, 0 }
   0xb   : > { %p587_p4 = por %p46_p2, %p45_p1  ;;  %s33_s17 = ssub.s32 %s520_s10, %s793_s14 }
   0xc   : > { %p77_p6 = scmp.eq.s32.totalorder %s322_s12, 1  ;;  %p36_p7 = scmp.eq.s32.totalorder %s33_s17, 0 }
   0xd   : > { %p593_p8 = por %p52_p5, %p51_p3  ;;  %p83_p10 = scmp.eq.s32.totalorder %s323_s13, 1 }
   0xe   : > { %p597_p9 = por %p77_p6, %p45_p1  ;;  %p352_p13 = scmp.lt.s32.totalorder %s524_s11, 2 }
   0xf   : > { %s602_s20 = scalar_select %p36_p7, %s512_s8, %s38_s15  }
  0x10   : > { %s773_s19 = scalar_select %p597_p9, 1, 0 }
  0x11   : > { %p604_p11 = por %p83_p10, %p51_p3  ;;  %s103_s22 = sand.u32 1, %s512_s8  }
  0x12   : > { %s326_s23 = sshll.u32 %s103_s22, 1  ;;  %s327_s24 = sshll.u32 %s520_s10, 5 }
  0x13   : > { %s774_s21 = scalar_select %p604_p11, 1, 0 }
  0x14   : > { %s615_s27 = scalar_lea.hbm %s768_s0, %s327_s24  ;;  %s107_s28 = scalar_lea.vmem [#allocation2], %s326_s23 }
  0x15   : > { %s115_s29 = sshll.u32 %s107_s28, 4  ;;  %p621_p0 = pnand %p352_p13, %p587_p4  ;;  %s617_s29 = int_to_ptr.vmem [resolvable:$true] %s115_s29 }
  0x16   : > { %s104_s2 = scalar_lea.sflag [#allocation3], %s103_s22  ;;  %s412_s3 = scalar_lea.hbm %s615_s27, 32 }
  0x17   : > { %p413_p3 = scmp.ne.s32.totalorder %s615_s27, %s412_s3  ;;  %p414_p5 = pneg %p621_p0 }
  0x18   : > { %s417_s12 = scalar_lea.hbm %s768_s0, 64  ;;  %p418_p4 = scmp.lt.u32.totalorder %s615_s27, %s768_s0 }
  0x19   : > { %p415_p6 = pnand %p414_p5, %p413_p3  ;;  %p419_p10 = scmp.lt.u32.totalorder %s417_s12, %s412_s3 }
  0x1a   : > { %p421_p12 = scmp.lt.u32.totalorder %s412_s3, %s615_s27 }
  0x1b   : > { %p416_p7 = pneg %p415_p6  ;;  %p420_p13 = por %p419_p10, %p418_p4 }
  0x1d   : > { %p422_p1 = por %p421_p12, %p420_p13 }
  0x1f   : > { %p423_p2 = pnand %p422_p1, %p416_p7 }
  0x21   : > { %426 = shalt.err (!%p423_p2)
}
  0x22   : > { %s427_s16 = scalar_lea.vmem %s617_s29, 32  ;;  %s526_s17 = smov [#allocation2]  }
  0x23   : > { %p428_p3 = scmp.ne.s32.totalorder %s617_s29, %s427_s16  ;;  %s432_s22 = sshll.u32 %s526_s17, 4  ;;  %s433_s22 = int_to_ptr.vmem [resolvable:$false] %s432_s22 }
  0x24   : > { %s434_s23 = scalar_lea.vmem %s433_s22, 64  ;;  %p435_p9 = scmp.lt.s32.totalorder %s617_s29, %s433_s22 }
  0x25   : > { %p430_p6 = pnand %p428_p3, %p414_p5  ;;  %p436_p4 = scmp.lt.s32.totalorder %s434_s23, %s427_s16 }
  0x27   : > { %p431_p11 = pneg %p430_p6  ;;  %p437_p10 = por %p436_p4, %p435_p9 }
  0x29   : > { %p438_p12 = pnand %p437_p10, %p431_p11 }
  0x2b   : > { %441 = shalt.err (!%p438_p12)
}
  0x2c   : > { %347 = dma.hbm_to_vmem [thread:$0]  (!%p621_p0), %s615_s27, 32, %s617_s29, %s104_s2  }
  0x2d   : > { %p776_p1 = scmp.lt.s32.totalorder %s524_s11, 3  ;;  %p777_p2 = scmp.ge.s32.totalorder %s524_s11, 1 }
  0x2f   : > { %p121_p5 = pnand %p777_p2, %p776_p1 }
  0x30   : > { %s657_s24 = sand.u32 (!%p121_p5), 1, %s508_s7  }
  0x31   : > { %124 = sbr.rel (%p121_p5) target bundleno = 221 (0xdd), region = 24  ;;  %s329_s25 = sshll.u32 (!%p121_p5), %s657_s24, 1 }
  0x32   : > { %s127_s26 = scalar_lea.sflag (!%p121_p5), [#allocation3], %s657_s24  ;;  %s130_s28 = scalar_lea.vmem (!%p121_p5), [#allocation2], %s329_s25 }
  0x38   : > { %495 = dma.done.wait (%p593_p8), %s127_s26, 32  }
  0x39   : > { %497 = vsyncadd (%p593_p8), %s127_s26, 4294967264  ;;  %v149_v0 = vld [vmem:[%s130_s28] sm:$0x3]  ;;  %vm173_vm0 = vcmask 1047554   ;;  %s527_s27 = smov 127   ;;  %s528_s29 = smov 111   ;;  %v152_v8 = vlaneseq }
  0x3a   : > { %v150_v1 = vmul.f32 1.442695, %v149_v0  ;;  %s529_s30 = smov 112   ;;  %s530_s18 = smov 113   ;;  %vm531_vm5 = vmmov 1   ;;  %v532_v22 = vmov 1000.0  }
  0x3b   : > { %v155_v9 = vshrl.u32 %v152_v8, 7  ;;  %v153_v10 = vand.u32 127, %v152_v8  ;;  %s330_s2 = sshll.u32 %s657_s24, 3  ;;  %s339_s5 = sshll.u32 %s516_s9, 7 }
  0x3c   : > { %410 = vpow2.f32 %v150_v1  ;;  %s148_s3 = scalar_lea.vmem [#allocation5], %s330_s2  ;;  %s719_s15 = scalar_lea.hbm %s769_s1, %s339_s5 }
  0x3d   : > { %v157_v11 = vmul.u32 128, %v155_v9  ;;  %vm195_vm9 = vcmp.lt.s32.totalorder %v153_v10, 111  ;;  %vm185_vm10 = vcmp.lt.s32.totalorder %v153_v10, 127  ;;  %vm206_vm13 = vcmp.lt.s32.totalorder %v153_v10, 112  ;;  %s238_s4 = sshll.u32 %s148_s3, 4  ;;  %s224_s9 = scalar_lea.sflag [#allocation4], %s657_s24  ;;  %s711_s4 = int_to_ptr.vmem [resolvable:$true] %s238_s4 }
  0x3e   : > { %s442_s16 = scalar_lea.vmem %s711_s4, 128  ;;  %p784_p9 = scmp.ne.s32.totalorder %s773_s19, 0 }
  0x3f   : > { %v160_v12 = vadd.s32 %v157_v11, %v153_v10  ;;  %p443_p8 = scmp.ne.s32.totalorder %s711_s4, %s442_s16  ;;  %s533_s17 = smov [#allocation5]  }
  0x40   : > { %s446_s22 = sshll.u32 %s533_s17, 4  ;;  %s447_s22 = int_to_ptr.vmem [resolvable:$false] %s446_s22 }
  0x41   : > { %v163_v13 = vand.u32 15, %v160_v12  ;;  %vm161_vm1 = vcmp.ge.s32.totalorder %v160_v12, 240  ;;  %vm162_vm2 = vcmp.lt.s32.totalorder %v160_v12, 16  ;;  %p444_p11 = pnand %p443_p8, %p784_p9  ;;  %s448_s23 = scalar_lea.vmem %s447_s22, 256 }
  0x42   : > { %vm166_vm4 = vmor %vm162_vm2, %vm161_vm1  ;;  %vm217_vm2 = vcmp.lt.s32.totalorder %v153_v10, 113  ;;  %p449_p7 = scmp.lt.s32.totalorder %s711_s4, %s447_s22  ;;  %p450_p13 = scmp.lt.s32.totalorder %s448_s23, %s442_s16 }
  0x43   : > { %vm674_vm3 = vcmp.eq.s32.totalorder %v163_v13, 15  ;;  %vm165_vm14 = vcmp.eq.s32.totalorder %v163_v13, 0  ;;  %p445_p0 = pneg %p444_p11 }
  0x44   : > { %vm167_vm6 = vmxor %vm674_vm3, %vm531_vm5  ;;  %p451_p3 = por %p450_p13, %p449_p7 }
  0x45   : > { %vm681_vm7 = vmand %vm166_vm4, %vm167_vm6 }
  0x46   : > { %v665_v2 = vpop.eup %410  ;;  %vm688_vm8 = vmor %vm674_vm3, %vm161_vm1  ;;  %v169_v23 = vsel %vm681_vm7, 0.0, %v532_v22  ;;  %p452_p6 = pnand %p451_p3, %p445_p0 }
  0x47   : > { %178 = vrot.lane.b32.xlu0 %v665_v2, %s527_s27  ;;  %191 = vrot.lane.b32.xlu1 %v665_v2, %s528_s29  ;;  %v174_v3 = vrot.slane %v665_v2, 6  ;;  %vm190_vm11 = vmor %vm688_vm8, %vm681_vm7 }
  0x48   : > { %vm172_vm12 = vmor %vm674_vm3, %vm681_vm7 }
  0x49   : > { %v175_v4 = vsel %vm173_vm0, %v174_v3, %v665_v2  ;;  %vm201_vm15 = vmor %vm161_vm1, %vm681_vm7 }
  0x4a   : > { %v176_v5 = vrot.slane %v175_v4, 6 }
  0x4b   : > { %202 = vrot.lane.b32.xlu0 %v665_v2, %s529_s30 }
  0x4c   : > { %v177_v6 = vsel %vm173_vm0, %v176_v5, %v665_v2  ;;  %vm171_vm0 = vmor %vm161_vm1, %vm165_vm14 }
  0x4d   : > { %v181_v7 = vrot.slane %v177_v6, 1  ;;  %vm212_vm3 = vmor %vm171_vm0, %vm681_vm7 }
  0x4f   : > { %193 = vrot.lane.b32.xlu1 %v181_v7, %s528_s29  ;;  %183 = vrot.lane.b32.xlu0 %v181_v7, %s527_s27 }
  0x53   : > { %204 = vrot.lane.b32.xlu1 %v181_v7, %s529_s30  ;;  %213 = vrot.lane.b32.xlu0 %v665_v2, %s530_s18 }
  0x57   : > { %215 = vrot.lane.b32.xlu1 %v181_v7, %s530_s18 }
  0xb9   : > { %v179_v15 = vpop.permute.xlu0 %178  ;;  %v192_v16 = vpop.permute.xlu1 %191 }
  0xbd   : > { %v203_v17 = vpop.permute.xlu0 %202 }
  0xc1   : > { %v194_v20 = vpop.permute.xlu1 %193  ;;  %v184_v21 = vpop.permute.xlu0 %183 }
  0xc2   : > { %v196_v24 = vsel %vm195_vm9, %v192_v16, %v194_v20  ;;  %v186_v25 = vsel %vm185_vm10, %v179_v15, %v184_v21 }
  0xc3   : > { %v197_v26 = vadd.f32 %v665_v2, %v196_v24  ;;  %v187_v27 = vadd.f32 %v665_v2, %v186_v25 }
  0xc5   : > { %v198_v28 = vsel %vm190_vm11, %v169_v23, %v197_v26  ;;  %v188_v29 = vsel %vm172_vm12, %v169_v23, %v187_v27  ;;  %v205_v30 = vpop.permute.xlu1 %204  ;;  %v214_v33 = vpop.permute.xlu0 %213 }
  0xc6   : > { %331 = vst [vmem:[%s148_s3 + $0x2] sm:$0x3] %v198_v28  ;;  %189 = vst [vmem:[%s148_s3] sm:$0x3] %v188_v29  ;;  %v207_v31 = vsel %vm206_vm13, %v203_v17, %v205_v30 }
  0xc7   : > { %v208_v32 = vadd.f32 %v665_v2, %v207_v31 }
  0xc9   : > { %v209_v34 = vsel %vm201_vm15, %v169_v23, %v208_v32  ;;  %v216_v35 = vpop.permute.xlu1 %215 }
  0xca   : > { %332 = vst [vmem:[%s148_s3 + $0x4] sm:$0x3] %v209_v34  ;;  %v218_v36 = vsel %vm217_vm2, %v214_v33, %v216_v35 }
  0xcb   : > { %v219_v37 = vadd.f32 %v665_v2, %v218_v36 }
  0xcd   : > { %v220_v38 = vsel %vm212_vm3, %v169_v23, %v219_v37 }
  0xce   : > { %333 = vst [vmem:[%s148_s3 + $0x6] sm:$0x3] %v220_v38 }
  0xcf   : > { %455 = shalt.err (!%p452_p6)
}
  0xd0   : > { %s456_s25 = scalar_lea.hbm %s719_s15, 128  ;;  %s460_s27 = scalar_lea.hbm %s769_s1, 256 }
  0xd1   : > { %p457_p4 = scmp.ne.s32.totalorder %s719_s15, %s456_s25  ;;  %p461_p1 = scmp.lt.u32.totalorder %s719_s15, %s769_s1 }
  0xd2   : > { %p462_p2 = scmp.lt.u32.totalorder %s460_s27, %s456_s25  ;;  %p464_p8 = scmp.lt.u32.totalorder %s456_s25, %s719_s15 }
  0xd3   : > { %p458_p10 = pnand %p457_p4, %p784_p9 }
  0xd4   : > { %p463_p5 = por %p462_p2, %p461_p1 }
  0xd5   : > { %p459_p12 = pneg %p458_p10 }
  0xd6   : > { %p465_p11 = por %p464_p8, %p463_p5 }
  0xd8   : > { %p466_p0 = pnand %p465_p11, %p459_p12 }
  0xda   : > { %469 = shalt.err (!%p466_p0)
}
  0xdb   : > { %s534_s18 = smov 32   ;;  %s535_s2 = smov 2  }
  0xdc   : > { %342 = dma.vmem_to_hbm [thread:$0]  (%p784_p9), %s711_s4, 128, %s719_s15, %s224_s9, %s534_s18, %s534_s18, %s535_s2  }
  0xdd PF: > { %s253_s3 = sand.u32 1, %s504_s6   ;;  %p785_p7 = scmp.ne.s32.totalorder %s774_s21, 0 }
  0xde   : > { %p786_p13 = scmp.ge.s32.totalorder %s524_s11, 2  ;;  %s254_s5 = scalar_lea.sflag [#allocation4], %s253_s3 }
  0xe0   : > { %p349_p3 = pnand %p786_p13, %p785_p7 }
  0xe2   : > { %499 = dma.done.wait (!%p349_p3), %s254_s5, 128  }
  0xe3   : > { %501 = vsyncadd (!%p349_p3), %s254_s5, 4294967168  ;;  %s17_s11 = sadd.s32 1, %s524_s11   ;;  %s787_s6 = smov %s508_s7 }
  0xe4   : > { %p14_p6 = scmp.ge.s32.totalorder %s17_s11, 4   ;;  %s788_s7 = smov %s512_s8 }
  0xe5   : > { %s789_s8 = smov %s602_s20  ;;  %s790_s9 = smov %s520_s10 }
  0xe6   : > { %s791_s10 = smov %s793_s14  ;;  %16 = sbr.rel (!%p14_p6) target bundleno = 6 (0x6), region = 72 }
  0xed   :  { %259 = vsyncpa [#allocation3], 1 }
  0xee   :  { %261 = vsyncpa [#allocation3 + $0x1], 1 }
  0xef   :  { %262 = vsyncpa [#allocation4], 1 }
  0xf0   :  { %264 = vsyncpa [#allocation4 + $0x1], 1 }

</bundles_post_ra>
